<compile_context>
chip_gen: v5e
topology: v5e:2x2
jax: 0.10.0
libtpu: 0.0.40
codegen_flags: <defaults>
</compile_context>

<pallas_src>
import numpy as np
import jax
import jax.numpy as jnp
from jax.experimental import pallas as pl
from jax.experimental.pallas import tpu as pltpu


# ----------------------------------------------------------------------------------
# Pallas kernel
# ----------------------------------------------------------------------------------
def _make_ride_kernel(n_rows, tile_n, s_scale, ce_uses_expert):
    """Returns the kernel body; static config is baked in via closure."""

    def kernel(elog_ref, olog_ref, tgt_ref, m_ref, w_ref, it_ref,
               num_ref, den_ref, kl_ref):
        i = pl.program_id(1)  # batch-tile index (reduction axis)

        @pl.when(i == 0)
        def _init():
            num_ref[...] = jnp.zeros_like(num_ref)
            den_ref[...] = jnp.zeros_like(den_ref)
            kl_ref[...] = jnp.zeros_like(kl_ref)

        xe = elog_ref[0].astype(jnp.float32)       # (tile_n, C) expert logits
        xo = olog_ref[...].astype(jnp.float32)     # (tile_n, C) shared output logits
        tgt = tgt_ref[...]                         # (tile_n, 1) int32
        m_row = m_ref[...].astype(jnp.float32)     # (1, C) LDAM margins
        w_row = w_ref[...].astype(jnp.float32)     # (1, C) CE class weights
        inv_t = it_ref[...].astype(jnp.float32)    # (1, C) 1 / diversity temperature

        tn, C = xe.shape

        # Mask rows of the (possibly padded) last tile.
        row_ids = jax.lax.broadcasted_iota(jnp.int32, (tn, 1), 0) + i * tile_n
        valid = row_ids < n_rows                   # (tile_n, 1) bool
        xe = jnp.where(valid, xe, 0.0)             # keep downstream exp/log finite
        xo = jnp.where(valid, xo, 0.0)

        cls_ids = jax.lax.broadcasted_iota(jnp.int32, (tn, C), 1)
        cls_mask = cls_ids == tgt                  # (tile_n, C) bool, one-hot of target

        # -------- LDAM-margin, class-weighted cross-entropy (accumulate num/den) ----
        xce = xe if ce_uses_expert else xo
        batch_m = jnp.sum(jnp.where(cls_mask, m_row, 0.0), axis=1, keepdims=True)
        final = jnp.where(cls_mask, xce - s_scale * batch_m, xce)

        fmax = jnp.max(final, axis=1, keepdims=True)
        lse = fmax + jnp.log(jnp.sum(jnp.exp(final - fmax), axis=1, keepdims=True))
        logit_t = jnp.sum(jnp.where(cls_mask, final, 0.0), axis=1, keepdims=True)
        logp_t = logit_t - lse                                        # (tile_n, 1)
        w_t = jnp.sum(jnp.where(cls_mask, w_row, 0.0), axis=1, keepdims=True)

        w_t = jnp.where(valid, w_t, 0.0)
        logp_t = jnp.where(valid, logp_t, 0.0)

        num_ref[...] += jnp.reshape(jnp.sum(-w_t * logp_t), (1, 1, 1))
        den_ref[...] += jnp.reshape(jnp.sum(w_t), (1, 1, 1))

        # -------- diversity KL:  sum_{i,c} p * (log p - log q)  ----------------------
        xq = xe * inv_t                            # expert logits / T
        xp = xo * inv_t                            # shared logits / T
        qmax = jnp.max(xq, axis=1, keepdims=True)
        q_lse = qmax + jnp.log(jnp.sum(jnp.exp(xq - qmax), axis=1, keepdims=True))
        logq = xq - q_lse

        pmax = jnp.max(xp, axis=1, keepdims=True)
        pe = jnp.exp(xp - pmax)
        psum = jnp.sum(pe, axis=1, keepdims=True)
        p = pe / psum
        logp = (xp - pmax) - jnp.log(psum)

        kl_row = jnp.sum(p * (logp - logq), axis=1, keepdims=True)    # (tile_n, 1)
        kl_row = jnp.where(valid, kl_row, 0.0)
        kl_ref[...] += jnp.reshape(jnp.sum(kl_row), (1, 1, 1))

    return kernel


def _round_up(x, m):
    return ((x + m - 1) // m) * m


def _auto_tile_n(n, c, itemsize, target_bytes=2 * 1024 * 1024):
    # ~2 MiB per streamed [tile_n, C] tile; two streamed inputs double-buffered
    # stays well under the 32 MiB scoped-VMEM default on v5e/v6e/v7x.
    rows = target_bytes // max(1, c * itemsize)
    rows = max(8, (rows // 8) * 8)
    return int(min(rows, _round_up(n, 8)))


def _ride_loss_terms(expert_logits, output_logits, target, m_list, w_base, inv_temp,
                     *, s, ce_uses_expert, tile_n=None):
    """Returns per-expert (ce_num, ce_den, kl_sum), each shape (E,), f32."""
    expert_logits = jnp.asarray(expert_logits)     # native dtype, no upcast here
    output_logits = jnp.asarray(output_logits)
    E, N, C = expert_logits.shape
    assert output_logits.shape == (N, C)

    if tile_n is None:
        tile_n = _auto_tile_n(N, C, jnp.dtype(expert_logits.dtype).itemsize)
    tile_n = max(8, (int(tile_n) // 8) * 8)
    tile_n = min(tile_n, _round_up(N, 8))
    grid = (E, pl.cdiv(N, tile_n))

    tgt2d = jnp.asarray(target, jnp.int32).reshape(N, 1)
    m2d = jnp.asarray(m_list, jnp.float32).reshape(1, C)
    w2d = jnp.asarray(w_base, jnp.float32).reshape(1, C)
    it2d = jnp.asarray(inv_temp, jnp.float32).reshape(1, C)

    kernel = _make_ride_kernel(N, tile_n, float(s), bool(ce_uses_expert))

    acc_spec = pl.BlockSpec((1, 1, 1), lambda e, i: (e, 0, 0))
    out_shape = tuple(jax.ShapeDtypeStruct((E, 1, 1), jnp.float32) for _ in range(3))

    ce_num, ce_den, kl_sum = pl.pallas_call(
        kernel,
        out_shape=out_shape,
        grid_spec=pltpu.PrefetchScalarGridSpec(
            num_scalar_prefetch=0,
            grid=grid,
            in_specs=[
                pl.BlockSpec((1, tile_n, C), lambda e, i: (e, i, 0)),  # expert logits
                pl.BlockSpec((tile_n, C), lambda e, i: (i, 0)),        # shared logits
                pl.BlockSpec((tile_n, 1), lambda e, i: (i, 0)),        # targets
                pl.BlockSpec((1, C), lambda e, i: (0, 0)),             # m_list (resident)
                pl.BlockSpec((1, C), lambda e, i: (0, 0)),             # CE class weights
                pl.BlockSpec((1, C), lambda e, i: (0, 0)),             # 1 / temperature
            ],
            out_specs=[acc_spec, acc_spec, acc_spec],
        ),
        compiler_params=pltpu.CompilerParams(
            dimension_semantics=("parallel", "arbitrary")),
    )(expert_logits, output_logits, tgt2d, m2d, w2d, it2d)

    return ce_num[:, 0, 0], ce_den[:, 0, 0], kl_sum[:, 0, 0]


# ----------------------------------------------------------------------------------
# RIDELoss module mirror (constants/weights computed host-side like the PyTorch init)
# ----------------------------------------------------------------------------------
class RIDELossPallas:
    def __init__(self, cls_num_list=None, base_diversity_temperature=1.0, max_m=0.5,
                 s=30, reweight=True, reweight_epoch=-1, base_loss_factor=1.0,
                 additional_diversity_factor=-0.2, reweight_factor=0.05):
        self.base_loss_factor = base_loss_factor
        self.reweight_epoch = reweight_epoch if reweight else -1
        self.base_diversity_temperature = float(base_diversity_temperature)
        self.additional_diversity_factor = float(additional_diversity_factor)
        # NOTE: PyTorch only creates these inside _hook_before_epoch (AttributeError if
        # the hook is never called); here they default to None (== unweighted CE).
        self.per_cls_weights_base = None
        self.per_cls_weights_diversity = None

        if cls_num_list is None:
            self.m_list = None
            self.s = s
            self.per_cls_weights_enabled = None
            self.per_cls_weights_enabled_diversity = None
            return

        cls_num = np.asarray(cls_num_list, dtype=np.float64)
        m_list = 1.0 / np.sqrt(np.sqrt(cls_num))
        m_list = m_list * (max_m / np.max(m_list))
        self.m_list = m_list.astype(np.float32)
        self.s = s
        assert s > 0

        if reweight_epoch != -1:
            beta = 0.9999
            effective_num = 1.0 - np.power(beta, cls_num)
            per_cls_weights = (1.0 - beta) / effective_num
            per_cls_weights = per_cls_weights / np.sum(per_cls_weights) * len(cls_num)
            self.per_cls_weights_enabled = per_cls_weights.astype(np.float32)
        else:
            self.per_cls_weights_enabled = None

        frac = cls_num / np.sum(cls_num)
        C = len(cls_num)
        w_div = C * frac * reweight_factor + 1 - reweight_factor
        w_div = w_div / np.max(w_div)
        assert np.all(w_div > 0), 'reweight factor is too large: out of bounds'
        self.per_cls_weights_enabled_diversity = w_div.astype(np.float32)

    def _hook_before_epoch(self, epoch):
        if self.reweight_epoch != -1:
            self.epoch = epoch
            if epoch > self.reweight_epoch:
                self.per_cls_weights_base = self.per_cls_weights_enabled
                self.per_cls_weights_diversity = self.per_cls_weights_enabled_diversity
            else:
                self.per_cls_weights_base = None
                self.per_cls_weights_diversity = None

    def forward(self, output_logits, target, extra_info=None, tile_n=None):
        N, C = output_logits.shape
        ones = np.ones((C,), np.float32)

        if extra_info is None:
            # plain mean cross-entropy (no margin, no class weights); KL output unused
            ce_num, ce_den, _ = _ride_loss_terms(
                output_logits[None], output_logits, target,
                np.zeros((C,), np.float32), ones, ones,
                s=0.0, ce_uses_expert=True, tile_n=tile_n)
            return (ce_num / ce_den)[0]

        expert_logits = jnp.stack([jnp.asarray(l) for l in extra_info["logits"]], axis=0)

        if self.m_list is None:
            m_vec = np.zeros((C,), np.float32)
            w_base = ones
            s = 0.0
        else:
            m_vec = self.m_list
            w_base = (self.per_cls_weights_base
                      if self.per_cls_weights_base is not None else ones)
            s = float(self.s)

        if self.per_cls_weights_diversity is not None:
            div_temp = self.base_diversity_temperature * self.per_cls_weights_diversity
            temperature_mean = float(np.mean(div_temp))
        else:
            div_temp = self.base_diversity_temperature * ones
            temperature_mean = self.base_diversity_temperature
        inv_temp = (1.0 / div_temp).astype(np.float32)

        ce_uses_expert = (self.additional_diversity_factor != 0)
        ce_num, ce_den, kl_sum = _ride_loss_terms(
            expert_logits, output_logits, target, m_vec, w_base, inv_temp,
            s=s, ce_uses_expert=ce_uses_expert, tile_n=tile_n)

        ce = jnp.sum(ce_num / ce_den)
        kl = jnp.sum(kl_sum) / float(N)
        return (self.base_loss_factor * ce
                + self.additional_diversity_factor * temperature_mean * temperature_mean * kl)

    __call__ = forward


# ----------------------------------------------------------------------------------
# Pure-JAX reference (mirrors the PyTorch math)
# ----------------------------------------------------------------------------------
def _reference_ride_loss(mod, output_logits, target, extra_info=None):
    output_logits = jnp.asarray(output_logits, jnp.float32)

    def cross_entropy(logits, tgt, weight=None):
        logp = jax.nn.log_softmax(logits.astype(jnp.float32), axis=-1)
        lp_t = jnp.take_along_axis(logp, tgt[:, None], axis=1)[:, 0]
        if weight is None:
            return jnp.mean(-lp_t)
        w_t = jnp.asarray(weight, jnp.float32)[tgt]
        return jnp.sum(-w_t * lp_t) / jnp.sum(w_t)

    if extra_info is None:
        return cross_entropy(output_logits, target)

    loss = 0.0
    N, C = output_logits.shape
    for logits_item in extra_info["logits"]:
        logits_item = jnp.asarray(logits_item, jnp.float32)
        ride_logits = output_logits if mod.additional_diversity_factor == 0 else logits_item
        if mod.m_list is None:
            loss += mod.base_loss_factor * cross_entropy(ride_logits, target)
        else:
            onehot = jax.nn.one_hot(target, C, dtype=jnp.float32)
            batch_m = onehot @ jnp.asarray(mod.m_list, jnp.float32)
            x_m = ride_logits - (batch_m * mod.s)[:, None]
            final = jnp.where(onehot > 0, x_m, ride_logits)
            loss += mod.base_loss_factor * cross_entropy(final, target,
                                                         mod.per_cls_weights_base)
        if mod.per_cls_weights_diversity is not None:
            dt = mod.base_diversity_temperature * jnp.asarray(
                mod.per_cls_weights_diversity, jnp.float32)
            tm = float(jnp.mean(dt))
        else:
            dt = mod.base_diversity_temperature
            tm = mod.base_diversity_temperature
        logq = jax.nn.log_softmax(logits_item / dt, axis=-1)
        p = jax.nn.softmax(output_logits / dt, axis=-1)
        kl = jnp.sum(p * (jnp.log(p) - logq)) / N
        loss += mod.additional_diversity_factor * tm * tm * kl
    return loss


# ----------------------------------------------------------------------------------
if __name__ == "__main__":
    N, C, E = 12, 32, 3          # batch, classes, experts (N=12, TILE_N=8 -> padded tile)
    key = jax.random.PRNGKey(0)
    k_out, k_tgt, *k_exp = jax.random.split(key, 2 + E)

    output_logits = jax.random.normal(k_out, (N, C), dtype=jnp.float32)
    target = jax.random.randint(k_tgt, (N,), 0, C, dtype=jnp.int32)
    expert_logits_list = [jax.random.normal(k, (N, C), dtype=jnp.float32) for k in k_exp]
    extra_info = {"logits": expert_logits_list}

    # deterministic long-tail class counts
    cls_num_list = [int(100 * (0.85 ** i)) + 1 for i in range(C)]

    module = RIDELossPallas(cls_num_list=cls_num_list, reweight=True, reweight_epoch=0)
    module._hook_before_epoch(epoch=1)   # activates per_cls_weights_base / _diversity

    # full RIDE path (margin + weighted CE + per-class-temperature KL), 3 experts
    loss = module.forward(output_logits, target, extra_info, tile_n=8)
    jax.block_until_ready(loss)
    ref = _reference_ride_loss(module, output_logits, target, extra_info)
    assert jnp.allclose(loss, ref, rtol=1e-4, atol=1e-4), (loss, ref)

    # extra_info=None path (plain mean cross-entropy)
    loss0 = module.forward(output_logits, target, extra_info=None, tile_n=8)
    jax.block_until_ready(loss0)
    ref0 = _reference_ride_loss(module, output_logits, target, None)
    assert jnp.allclose(loss0, ref0, rtol=1e-4, atol=1e-4), (loss0, ref0)

    print("KERNEL_OK")
</pallas_src>

<mosaic_0001>
module attributes {stable_mosaic.version = 11 : i64} {
  func.func @kernel(%arg0: i32, %arg1: i32, %arg2: memref<1x8x32xf32, #tpu.memory_space<vmem>>, %arg3: memref<8x32xf32, #tpu.memory_space<vmem>>, %arg4: memref<8x1xi32, #tpu.memory_space<vmem>>, %arg5: memref<1x32xf32, #tpu.memory_space<vmem>>, %arg6: memref<1x32xf32, #tpu.memory_space<vmem>>, %arg7: memref<1x32xf32, #tpu.memory_space<vmem>>, %arg8: memref<1x1x1xf32, #tpu.memory_space<vmem>>, %arg9: memref<1x1x1xf32, #tpu.memory_space<vmem>>, %arg10: memref<1x1x1xf32, #tpu.memory_space<vmem>>) attributes {dimension_semantics = [#tpu.dimension_semantics<parallel>, #tpu.dimension_semantics<arbitrary>], iteration_bounds = array<i64: 3, 2>, scalar_prefetch = 0 : i64, scratch_operands = 0 : i64, tpu.core_type = #tpu.core_type<tc>, window_params = [{transform_indices = @transform_0, window_bounds = array<i64: 1, 8, 32>}, {transform_indices = @transform_1, window_bounds = array<i64: 8, 32>}, {transform_indices = @transform_2, window_bounds = array<i64: 8, 1>}, {pipeline_mode = #tpu.pipeline_mode<synchronous>, transform_indices = @transform_3, window_bounds = array<i64: 1, 32>}, {pipeline_mode = #tpu.pipeline_mode<synchronous>, transform_indices = @transform_4, window_bounds = array<i64: 1, 32>}, {pipeline_mode = #tpu.pipeline_mode<synchronous>, transform_indices = @transform_5, window_bounds = array<i64: 1, 32>}, {transform_indices = @transform_6, window_bounds = array<i64: 1, 1, 1>}, {transform_indices = @transform_7, window_bounds = array<i64: 1, 1, 1>}, {transform_indices = @transform_8, window_bounds = array<i64: 1, 1, 1>}]} {
    %c0_i32 = arith.constant 0 : i32
    %0 = arith.cmpi eq, %arg1, %c0_i32 : i32
    %1 = arith.extui %0 : i1 to i32
    %c0_i32_0 = arith.constant 0 : i32
    %2 = arith.cmpi ne, %1, %c0_i32_0 : i32
    scf.if %2 {
      %cst_53 = arith.constant 0.000000e+00 : f32
      %124 = vector.broadcast %cst_53 : f32 to vector<1x1x1xf32>
      %c0_54 = arith.constant 0 : index
      %c0_55 = arith.constant 0 : index
      %c0_56 = arith.constant 0 : index
      %125 = vector.load %arg8[%c0_54, %c0_55, %c0_56] : memref<1x1x1xf32, #tpu.memory_space<vmem>>, vector<1x1x1xf32>
      tpu.vector_store %arg8[%c0_54, %c0_55, %c0_56], %124 {strides = array<i32>} : memref<1x1x1xf32, #tpu.memory_space<vmem>>, vector<1x1x1xf32>,
      %cst_57 = arith.constant 0.000000e+00 : f32
      %126 = vector.broadcast %cst_57 : f32 to vector<1x1x1xf32>
      %c0_58 = arith.constant 0 : index
      %c0_59 = arith.constant 0 : index
      %c0_60 = arith.constant 0 : index
      %127 = vector.load %arg9[%c0_58, %c0_59, %c0_60] : memref<1x1x1xf32, #tpu.memory_space<vmem>>, vector<1x1x1xf32>
      tpu.vector_store %arg9[%c0_58, %c0_59, %c0_60], %126 {strides = array<i32>} : memref<1x1x1xf32, #tpu.memory_space<vmem>>, vector<1x1x1xf32>,
      %cst_61 = arith.constant 0.000000e+00 : f32
      %128 = vector.broadcast %cst_61 : f32 to vector<1x1x1xf32>
      %c0_62 = arith.constant 0 : index
      %c0_63 = arith.constant 0 : index
      %c0_64 = arith.constant 0 : index
      %129 = vector.load %arg10[%c0_62, %c0_63, %c0_64] : memref<1x1x1xf32, #tpu.memory_space<vmem>>, vector<1x1x1xf32>
      tpu.vector_store %arg10[%c0_62, %c0_63, %c0_64], %128 {strides = array<i32>} : memref<1x1x1xf32, #tpu.memory_space<vmem>>, vector<1x1x1xf32>,
    } else {
    }
    %c0 = arith.constant 0 : index
    %c0_1 = arith.constant 0 : index
    %c0_2 = arith.constant 0 : index
    %3 = vector.load %arg2[%c0, %c0_1, %c0_2] : memref<1x8x32xf32, #tpu.memory_space<vmem>>, vector<1x8x32xf32>
    %4 = vector.shape_cast %3 : vector<1x8x32xf32> to vector<8x32xf32>
    %c0_3 = arith.constant 0 : index
    %c0_4 = arith.constant 0 : index
    %5 = vector.load %arg3[%c0_3, %c0_4] : memref<8x32xf32, #tpu.memory_space<vmem>>, vector<8x32xf32>
    %c0_5 = arith.constant 0 : index
    %c0_6 = arith.constant 0 : index
    %6 = vector.load %arg4[%c0_5, %c0_6] : memref<8x1xi32, #tpu.memory_space<vmem>>, vector<8x1xi32>
    %c0_7 = arith.constant 0 : index
    %c0_8 = arith.constant 0 : index
    %7 = vector.load %arg5[%c0_7, %c0_8] : memref<1x32xf32, #tpu.memory_space<vmem>>, vector<1x32xf32>
    %c0_9 = arith.constant 0 : index
    %c0_10 = arith.constant 0 : index
    %8 = vector.load %arg6[%c0_9, %c0_10] : memref<1x32xf32, #tpu.memory_space<vmem>>, vector<1x32xf32>
    %c0_11 = arith.constant 0 : index
    %c0_12 = arith.constant 0 : index
    %9 = vector.load %arg7[%c0_11, %c0_12] : memref<1x32xf32, #tpu.memory_space<vmem>>, vector<1x32xf32>
    %10 = tpu.iota {dimensions = array<i32: 0>} : vector<8x1xi32>
    %c8_i32 = arith.constant 8 : i32
    %11 = arith.muli %arg1, %c8_i32 : i32
    %12 = vector.broadcast %11 : i32 to vector<8x1xi32>
    %13 = arith.addi %10, %12 : vector<8x1xi32>
    %c12_i32 = arith.constant 12 : i32
    %14 = vector.broadcast %c12_i32 : i32 to vector<8x1xi32>
    %15 = arith.cmpi slt, %13, %14 : vector<8x1xi32>
    %cst = arith.constant 0.000000e+00 : f32
    %16 = vector.shape_cast %15 : vector<8x1xi1> to vector<8x1xi1>
    %17 = vector.broadcast %16 : vector<8x1xi1> to vector<8x32xi1>
    %18 = vector.broadcast %cst : f32 to vector<8x32xf32>
    %19 = arith.select %17, %4, %18 : vector<8x32xi1>, vector<8x32xf32>
    %cst_13 = arith.constant 0.000000e+00 : f32
    %20 = vector.shape_cast %15 : vector<8x1xi1> to vector<8x1xi1>
    %21 = vector.broadcast %20 : vector<8x1xi1> to vector<8x32xi1>
    %22 = vector.broadcast %cst_13 : f32 to vector<8x32xf32>
    %23 = arith.select %21, %5, %22 : vector<8x32xi1>, vector<8x32xf32>
    %24 = tpu.iota {dimensions = array<i32: 1>} : vector<8x32xi32>
    %25 = vector.broadcast %6 : vector<8x1xi32> to vector<8x32xi32>
    %26 = arith.cmpi eq, %24, %25 : vector<8x32xi32>
    %cst_14 = arith.constant 0.000000e+00 : f32
    %27 = vector.shape_cast %7 : vector<1x32xf32> to vector<1x32xf32>
    %28 = vector.broadcast %27 : vector<1x32xf32> to vector<8x32xf32>
    %29 = vector.broadcast %cst_14 : f32 to vector<8x32xf32>
    %30 = arith.select %26, %28, %29 : vector<8x32xi1>, vector<8x32xf32>
    %cst_15 = arith.constant dense<0.000000e+00> : vector<8xf32>
    %31 = vector.multi_reduction <add>, %30, %cst_15 [1] : vector<8x32xf32> to vector<8xf32>
    %32 = vector.shape_cast %31 : vector<8xf32> to vector<8x1xf32>
    %cst_16 = arith.constant 3.000000e+01 : f32
    %33 = vector.broadcast %cst_16 : f32 to vector<8x1xf32>
    %34 = arith.mulf %33, %32 : vector<8x1xf32>
    %35 = vector.broadcast %34 : vector<8x1xf32> to vector<8x32xf32>
    %36 = arith.subf %19, %35 : vector<8x32xf32>
    %37 = arith.select %26, %36, %19 : vector<8x32xi1>, vector<8x32xf32>
    %cst_17 = arith.constant dense<0xFF800000> : vector<8xf32>
    %38 = vector.multi_reduction <maximumf>, %37, %cst_17 [1] : vector<8x32xf32> to vector<8xf32>
    %39 = vector.shape_cast %38 : vector<8xf32> to vector<8x1xf32>
    %40 = vector.broadcast %39 : vector<8x1xf32> to vector<8x32xf32>
    %41 = arith.subf %37, %40 : vector<8x32xf32>
    %42 = math.exp %41 : vector<8x32xf32>
    %cst_18 = arith.constant dense<0.000000e+00> : vector<8xf32>
    %43 = vector.multi_reduction <add>, %42, %cst_18 [1] : vector<8x32xf32> to vector<8xf32>
    %44 = vector.shape_cast %43 : vector<8xf32> to vector<8x1xf32>
    %45 = math.log %44 : vector<8x1xf32>
    %46 = arith.addf %39, %45 : vector<8x1xf32>
    %cst_19 = arith.constant 0.000000e+00 : f32
    %47 = vector.broadcast %cst_19 : f32 to vector<8x32xf32>
    %48 = arith.select %26, %37, %47 : vector<8x32xi1>, vector<8x32xf32>
    %cst_20 = arith.constant dense<0.000000e+00> : vector<8xf32>
    %49 = vector.multi_reduction <add>, %48, %cst_20 [1] : vector<8x32xf32> to vector<8xf32>
    %50 = vector.shape_cast %49 : vector<8xf32> to vector<8x1xf32>
    %51 = arith.subf %50, %46 : vector<8x1xf32>
    %cst_21 = arith.constant 0.000000e+00 : f32
    %52 = vector.shape_cast %8 : vector<1x32xf32> to vector<1x32xf32>
    %53 = vector.broadcast %52 : vector<1x32xf32> to vector<8x32xf32>
    %54 = vector.broadcast %cst_21 : f32 to vector<8x32xf32>
    %55 = arith.select %26, %53, %54 : vector<8x32xi1>, vector<8x32xf32>
    %cst_22 = arith.constant dense<0.000000e+00> : vector<8xf32>
    %56 = vector.multi_reduction <add>, %55, %cst_22 [1] : vector<8x32xf32> to vector<8xf32>
    %57 = vector.shape_cast %56 : vector<8xf32> to vector<8x1xf32>
    %cst_23 = arith.constant 0.000000e+00 : f32
    %58 = vector.broadcast %cst_23 : f32 to vector<8x1xf32>
    %59 = arith.select %15, %57, %58 : vector<8x1xi1>, vector<8x1xf32>
    %cst_24 = arith.constant 0.000000e+00 : f32
    %60 = vector.broadcast %cst_24 : f32 to vector<8x1xf32>
    %61 = arith.select %15, %51, %60 : vector<8x1xi1>, vector<8x1xf32>
    %c0_25 = arith.constant 0 : index
    %c0_26 = arith.constant 0 : index
    %c0_27 = arith.constant 0 : index
    %62 = vector.load %arg8[%c0_25, %c0_26, %c0_27] : memref<1x1x1xf32, #tpu.memory_space<vmem>>, vector<1x1x1xf32>
    %cst_28 = arith.constant 0.000000e+00 : f32
    %63 = vector.broadcast %cst_28 : f32 to vector<8x1xf32>
    %64 = arith.subf %63, %59 : vector<8x1xf32>
    %65 = arith.mulf %64, %61 : vector<8x1xf32>
    %66 = vector.shape_cast %65 : vector<8x1xf32> to vector<1x8x1xf32>
    %cst_29 = arith.constant dense<0.000000e+00> : vector<1xf32>
    %67 = vector.multi_reduction <add>, %66, %cst_29 [1, 2] : vector<1x8x1xf32> to vector<1xf32>
    %68 = vector.shape_cast %67 : vector<1xf32> to vector<1x1x1xf32>
    %69 = vector.extract %68[0, 0, 0] : f32 from vector<1x1x1xf32>
    %70 = vector.broadcast %69 : f32 to vector<1x1x1xf32>
    %71 = arith.addf %62, %70 : vector<1x1x1xf32>
    %c0_30 = arith.constant 0 : index
    %c0_31 = arith.constant 0 : index
    %c0_32 = arith.constant 0 : index
    %72 = vector.load %arg8[%c0_30, %c0_31, %c0_32] : memref<1x1x1xf32, #tpu.memory_space<vmem>>, vector<1x1x1xf32>
    tpu.vector_store %arg8[%c0_30, %c0_31, %c0_32], %71 {strides = array<i32>} : memref<1x1x1xf32, #tpu.memory_space<vmem>>, vector<1x1x1xf32>,
    %c0_33 = arith.constant 0 : index
    %c0_34 = arith.constant 0 : index
    %c0_35 = arith.constant 0 : index
    %73 = vector.load %arg9[%c0_33, %c0_34, %c0_35] : memref<1x1x1xf32, #tpu.memory_space<vmem>>, vector<1x1x1xf32>
    %74 = vector.shape_cast %59 : vector<8x1xf32> to vector<1x8x1xf32>
    %cst_36 = arith.constant dense<0.000000e+00> : vector<1xf32>
    %75 = vector.multi_reduction <add>, %74, %cst_36 [1, 2] : vector<1x8x1xf32> to vector<1xf32>
    %76 = vector.shape_cast %75 : vector<1xf32> to vector<1x1x1xf32>
    %77 = vector.extract %76[0, 0, 0] : f32 from vector<1x1x1xf32>
    %78 = vector.broadcast %77 : f32 to vector<1x1x1xf32>
    %79 = arith.addf %73, %78 : vector<1x1x1xf32>
    %c0_37 = arith.constant 0 : index
    %c0_38 = arith.constant 0 : index
    %c0_39 = arith.constant 0 : index
    %80 = vector.load %arg9[%c0_37, %c0_38, %c0_39] : memref<1x1x1xf32, #tpu.memory_space<vmem>>, vector<1x1x1xf32>
    tpu.vector_store %arg9[%c0_37, %c0_38, %c0_39], %79 {strides = array<i32>} : memref<1x1x1xf32, #tpu.memory_space<vmem>>, vector<1x1x1xf32>,
    %81 = vector.broadcast %9 : vector<1x32xf32> to vector<8x32xf32>
    %82 = arith.mulf %19, %81 : vector<8x32xf32>
    %83 = vector.broadcast %9 : vector<1x32xf32> to vector<8x32xf32>
    %84 = arith.mulf %23, %83 : vector<8x32xf32>
    %cst_40 = arith.constant dense<0xFF800000> : vector<8xf32>
    %85 = vector.multi_reduction <maximumf>, %82, %cst_40 [1] : vector<8x32xf32> to vector<8xf32>
    %86 = vector.shape_cast %85 : vector<8xf32> to vector<8x1xf32>
    %87 = vector.broadcast %86 : vector<8x1xf32> to vector<8x32xf32>
    %88 = arith.subf %82, %87 : vector<8x32xf32>
    %89 = math.exp %88 : vector<8x32xf32>
    %cst_41 = arith.constant dense<0.000000e+00> : vector<8xf32>
    %90 = vector.multi_reduction <add>, %89, %cst_41 [1] : vector<8x32xf32> to vector<8xf32>
    %91 = vector.shape_cast %90 : vector<8xf32> to vector<8x1xf32>
    %92 = math.log %91 : vector<8x1xf32>
    %93 = arith.addf %86, %92 : vector<8x1xf32>
    %94 = vector.broadcast %93 : vector<8x1xf32> to vector<8x32xf32>
    %95 = arith.subf %82, %94 : vector<8x32xf32>
    %cst_42 = arith.constant dense<0xFF800000> : vector<8xf32>
    %96 = vector.multi_reduction <maximumf>, %84, %cst_42 [1] : vector<8x32xf32> to vector<8xf32>
    %97 = vector.shape_cast %96 : vector<8xf32> to vector<8x1xf32>
    %98 = vector.broadcast %97 : vector<8x1xf32> to vector<8x32xf32>
    %99 = arith.subf %84, %98 : vector<8x32xf32>
    %100 = math.exp %99 : vector<8x32xf32>
    %cst_43 = arith.constant dense<0.000000e+00> : vector<8xf32>
    %101 = vector.multi_reduction <add>, %100, %cst_43 [1] : vector<8x32xf32> to vector<8xf32>
    %102 = vector.shape_cast %101 : vector<8xf32> to vector<8x1xf32>
    %103 = vector.broadcast %102 : vector<8x1xf32> to vector<8x32xf32>
    %104 = arith.divf %100, %103 : vector<8x32xf32>
    %105 = vector.broadcast %97 : vector<8x1xf32> to vector<8x32xf32>
    %106 = arith.subf %84, %105 : vector<8x32xf32>
    %107 = math.log %102 : vector<8x1xf32>
    %108 = vector.broadcast %107 : vector<8x1xf32> to vector<8x32xf32>
    %109 = arith.subf %106, %108 : vector<8x32xf32>
    %110 = arith.subf %109, %95 : vector<8x32xf32>
    %111 = arith.mulf %104, %110 : vector<8x32xf32>
    %cst_44 = arith.constant dense<0.000000e+00> : vector<8xf32>
    %112 = vector.multi_reduction <add>, %111, %cst_44 [1] : vector<8x32xf32> to vector<8xf32>
    %113 = vector.shape_cast %112 : vector<8xf32> to vector<8x1xf32>
    %cst_45 = arith.constant 0.000000e+00 : f32
    %114 = vector.broadcast %cst_45 : f32 to vector<8x1xf32>
    %115 = arith.select %15, %113, %114 : vector<8x1xi1>, vector<8x1xf32>
    %c0_46 = arith.constant 0 : index
    %c0_47 = arith.constant 0 : index
    %c0_48 = arith.constant 0 : index
    %116 = vector.load %arg10[%c0_46, %c0_47, %c0_48] : memref<1x1x1xf32, #tpu.memory_space<vmem>>, vector<1x1x1xf32>
    %117 = vector.shape_cast %115 : vector<8x1xf32> to vector<1x8x1xf32>
    %cst_49 = arith.constant dense<0.000000e+00> : vector<1xf32>
    %118 = vector.multi_reduction <add>, %117, %cst_49 [1, 2] : vector<1x8x1xf32> to vector<1xf32>
    %119 = vector.shape_cast %118 : vector<1xf32> to vector<1x1x1xf32>
    %120 = vector.extract %119[0, 0, 0] : f32 from vector<1x1x1xf32>
    %121 = vector.broadcast %120 : f32 to vector<1x1x1xf32>
    %122 = arith.addf %116, %121 : vector<1x1x1xf32>
    %c0_50 = arith.constant 0 : index
    %c0_51 = arith.constant 0 : index
    %c0_52 = arith.constant 0 : index
    %123 = vector.load %arg10[%c0_50, %c0_51, %c0_52] : memref<1x1x1xf32, #tpu.memory_space<vmem>>, vector<1x1x1xf32>
    tpu.vector_store %arg10[%c0_50, %c0_51, %c0_52], %122 {strides = array<i32>} : memref<1x1x1xf32, #tpu.memory_space<vmem>>, vector<1x1x1xf32>,
    return
  }
  func.func @transform_0(%arg0: i32, %arg1: i32) -> (i32, i32, i32) {
    %c0_i32 = arith.constant 0 : i32
    %c0_i32_0 = arith.constant 0 : i32
    return %arg0, %arg1, %c0_i32 : i32, i32, i32
  }
  func.func @transform_1(%arg0: i32, %arg1: i32) -> (i32, i32) {
    %c0_i32 = arith.constant 0 : i32
    %c0_i32_0 = arith.constant 0 : i32
    return %arg1, %c0_i32 : i32, i32
  }
  func.func @transform_2(%arg0: i32, %arg1: i32) -> (i32, i32) {
    %c0_i32 = arith.constant 0 : i32
    %c0_i32_0 = arith.constant 0 : i32
    return %arg1, %c0_i32 : i32, i32
  }
  func.func @transform_3(%arg0: i32, %arg1: i32) -> (i32, i32) {
    %c0_i32 = arith.constant 0 : i32
    %c0_i32_0 = arith.constant 0 : i32
    %c0_i32_1 = arith.constant 0 : i32
    return %c0_i32, %c0_i32_0 : i32, i32
  }
  func.func @transform_4(%arg0: i32, %arg1: i32) -> (i32, i32) {
    %c0_i32 = arith.constant 0 : i32
    %c0_i32_0 = arith.constant 0 : i32
    %c0_i32_1 = arith.constant 0 : i32
    return %c0_i32, %c0_i32_0 : i32, i32
  }
  func.func @transform_5(%arg0: i32, %arg1: i32) -> (i32, i32) {
    %c0_i32 = arith.constant 0 : i32
    %c0_i32_0 = arith.constant 0 : i32
    %c0_i32_1 = arith.constant 0 : i32
    return %c0_i32, %c0_i32_0 : i32, i32
  }
  func.func @transform_6(%arg0: i32, %arg1: i32) -> (i32, i32, i32) {
    %c0_i32 = arith.constant 0 : i32
    %c0_i32_0 = arith.constant 0 : i32
    %c0_i32_1 = arith.constant 0 : i32
    return %arg0, %c0_i32, %c0_i32_0 : i32, i32, i32
  }
  func.func @transform_7(%arg0: i32, %arg1: i32) -> (i32, i32, i32) {
    %c0_i32 = arith.constant 0 : i32
    %c0_i32_0 = arith.constant 0 : i32
    %c0_i32_1 = arith.constant 0 : i32
    return %arg0, %c0_i32, %c0_i32_0 : i32, i32, i32
  }
  func.func @transform_8(%arg0: i32, %arg1: i32) -> (i32, i32, i32) {
    %c0_i32 = arith.constant 0 : i32
    %c0_i32_0 = arith.constant 0 : i32
    %c0_i32_1 = arith.constant 0 : i32
    return %arg0, %c0_i32, %c0_i32_0 : i32, i32, i32
  }
}

</mosaic_0001>

<bundles_post_ra>
// kernel: tpu_custom_call.1
= control target key start
LH: loop header
LB: loop body
LE: loop exit
PB: predicated region body
PF: predicated region fallthrough
CT: control target
= control target key end

     0   :  { %s1148_s0 = inlined_call_operand.hbm [shape: f32[3,12,32], index: 0, kind: input, shape index: {}]   ;;  %s1149_s1 = inlined_call_operand.vmem [shape: f32[12,32], index: 1, kind: input, shape index: {}]   ;;  %s1150_s2 = inlined_call_operand.vmem [shape: s32[12,1], index: 2, kind: input, shape index: {}]   ;;  %s1151_s3 = inlined_call_operand.vmem [shape: f32[1,32], index: 3, kind: input, shape index: {}]   ;;  %s1152_s4 = inlined_call_operand.vmem [shape: f32[1,32], index: 4, kind: input, shape index: {}]   ;;  %s1153_s5 = inlined_call_operand.vmem [shape: f32[1,32], index: 5, kind: input, shape index: {}]   ;;  %s1154_s6 = inlined_call_operand.vmem [shape: f32[3,1,1], index: 6, kind: output, shape index: {0}]   ;;  %s1155_s7 = inlined_call_operand.vmem [shape: f32[3,1,1], index: 7, kind: output, shape index: {1}]   ;;  %s1156_s8 = inlined_call_operand.vmem [shape: f32[3,1,1], index: 8, kind: output, shape index: {2}]  }
   0x1   :  { %1159 = sst [smem:[#allocation7_spill]] %s1151_s3 }
   0x2   :  { %1160 = sst [smem:[#allocation8_spill]] %s1152_s4 }
   0x3   :  { %1161 = sst [smem:[#allocation9_spill]] %s1153_s5 }
   0x4   :  { %14 = vsyncpa [#allocation3], 0 }
   0x5   :  { %16 = vsyncpa [#allocation3 + $0x1], 0  ;;  %s955_s27 = smov 0   ;;  %s957_s28 = smov 0  }
   0x6   :  { %s959_s29 = smov 0   ;;  %s961_s30 = smov 0  }
   0x7   :  { %s963_s9 = smov 0   ;;  %s965_s10 = smov 0  }
   0x8   :  { %s967_s11 = smov 0   ;;  %s969_s12 = smov 0  }
   0x9 LB: > { %s698_s13 = sadd.s32 4294967295, %s906_s12   ;;  %s31_s14 = sadd.s32 1, %s898_s10  ;;  %s906_s12 = sphi %s969_s12, %s22_s12   ;;  %s902_s11 = sphi %s967_s11, %s1178_s11   ;;  %s898_s10 = sphi %s965_s10, %s1177_s10   ;;  %s894_s9 = sphi %s963_s9, %s1176_s9   ;;  %s890_s30 = sphi %s961_s30, %s1175_s30   ;;  %s886_s29 = sphi %s959_s29, %s1174_s29   ;;  %s882_s28 = sphi %s957_s28, %s1173_s28   ;;  %s878_s27 = sphi %s955_s27, %s1172_s27  }
   0xa   : > { %p32_p0 = scmp.ge.s32.totalorder %s31_s14, 2  ;;  %s34_s15 = sadd.s32 1, %s902_s11 }
   0xb   : > { %s43_s16 = sadd.s32 1, %s886_s29  ;;  %p50_p1 = scmp.ne.s32.totalorder %s886_s29, %s882_s28 }
   0xc   : > { %s1180_s14 = smov (%p32_p0, %s31_s14), 0  ;;  %s1182_s15 = smov (!%p32_p0, %s34_s15), %s902_s11 }
   0xd   : > { %1162 = sst [smem:[#allocation5_spill]] %s1180_s14  ;;  %s39_s17 = ssub.s32 %s898_s10, %s1180_s14 }
   0xe   : > { %p51_p2 = scmp.eq.s32.totalorder %s906_s12, 0  ;;  %p36_p3 = scmp.ge.s32.totalorder %s1182_s15, 3 }
   0xf   : > { %p56_p4 = scmp.ne.s32.totalorder %s882_s28, %s878_s27  ;;  %p57_p6 = scmp.eq.s32.totalorder %s698_s13, 0 }
  0x10   : > { %p1006_p5 = por %p51_p2, %p50_p1  ;;  %s1184_s15 = smov (%p36_p3, %s1182_s15), 0 }
  0x11   : > { %1164 = sst [smem:[#allocation6_spill]] %s1184_s15  ;;  %p1012_p7 = por %p57_p6, %p56_p4 }
  0x12   : > { %s38_s20 = ssub.s32 %s902_s11, %s1184_s15  ;;  %p725_p8 = scmp.lt.s32.totalorder %s906_s12, 6 }
  0x13   : > { %s40_s21 = sor.u32 %s39_s17, %s38_s20  ;;  %s282_s22 = sand.u32 1, %s886_s29  }
  0x14   : > { %p41_p9 = scmp.eq.s32.totalorder %s40_s21, 0  ;;  %s702_s23 = sshll.u32 %s282_s22, 3 }
  0x15   : > { %s703_s24 = sshll.u32 %s902_s11, 1  ;;  %s286_s13 = scalar_lea.vmem [#allocation2], %s702_s23 }
  0x16   : > { %s1022_s25 = scalar_select %p41_p9, %s886_s29, %s43_s16  }
  0x17   : > { %s290_s26 = sadd.s32 %s898_s10, %s703_s24  ;;  %s296_s14 = sshll.u32 %s286_s13, 4  ;;  %s297_s14 = int_to_ptr.vmem [resolvable:$true] %s296_s14 }
  0x18   : > { %s704_s27 = sshll.u32 %s290_s26, 3  ;;  %p722_p10 = pnand %p725_p8, %p1006_p5 }
  0x19   : > { %s292_s5 = scalar_lea.hbm %s1148_s0, %s704_s27  ;;  %p705_p11 = scmp.ge.s32.totalorder %s906_s12, 1 }
  0x1a   : > { %s294_s15 = sshll.u32 %s292_s5, 4  ;;  %p315_p12 = scmp.lt.s32.totalorder %s906_s12, 7  ;;  %s295_s15 = int_to_ptr.hbm [resolvable:$true] %s294_s15 }
  0x1b   : > { %s283_s17 = scalar_lea.sflag [#allocation3], %s282_s22 }
  0x1c   : > { %724 = dma.hbm_to_vmem [thread:$0]  (!%p722_p10), %s295_s15, 128, %s297_s14, %s283_s17  }
  0x1d   : > { %p316_p13 = pnand %p705_p11, %p315_p12 }
  0x1e   : > { %s321_s16 = sand.u32 (!%p316_p13), 1, %s882_s28  }
  0x1f   : > { %319 = sbr.rel (%p316_p13) target bundleno = 742 (0x2e6), region = 44  ;;  %s1035_s20 = sshll.u32 (!%p316_p13), %s321_s16, 3 }
  0x20   : > { %s322_s3 = scalar_lea.sflag (!%p316_p13), [#allocation3], %s321_s16 }
  0x24   : > { %873 = dma.done.wait (%p1012_p7), %s322_s3, 128  }
  0x25   : > { %875 = vsyncadd (%p1012_p7), %s322_s3, 4294967168  ;;  %p371_p0 = scmp.lt.s32.totalorder %s890_s30, 1  ;;  %p379_p1 = scmp.lt.s32.totalorder %s894_s9, 2 }
  0x26   : > { %p709_p2 = scmp.ne.s32.totalorder %s890_s30, 0 }
  0x27   : > { %s372_s5 = scalar_select %p371_p0, %s890_s30, 1 }
  0x28   : > { %s1186_s9 = smov (!%p379_p1, %s894_s9), 2  ;;  %391 = sbr.rel (%p709_p2) target bundleno = 49 (0x31), region = 52 }
  0x29   : > { %s707_s14 = sshll.u32 %s372_s5, 3  ;;  %s1055_s27 = scalar_lea.vmem %s1154_s6, %s1186_s9 }
  0x2a   : > { %s374_s21 = scalar_lea.vmem %s1149_s1, %s707_s14  ;;  %s378_s24 = scalar_lea.vmem %s1150_s2, %s707_s14 }
  0x2b   : > { %s1060_s16 = scalar_lea.vmem %s1155_s7, %s1186_s9  ;;  %s1065_s4 = scalar_lea.vmem %s1156_s8, %s1186_s9 }
  0x2d   : > { %vm392_vm0 = vcmask 0   ;;  %v908_v0 = vmov 0.0  }
  0x2e   : > { %393 = vst.msk [vmem:[%s1055_s27] sm:$0x1] %vm392_vm0, %v908_v0 }
  0x2f   : > { %394 = vst.msk [vmem:[%s1060_s16] sm:$0x1] %vm392_vm0, %v908_v0 }
  0x30   : > { %395 = vst.msk [vmem:[%s1065_s4] sm:$0x1] %vm392_vm0, %v908_v0 }
  0x31 PF: > { %v398_v1 = vld [vmem:[%s378_s24] sm:$0xff]  ;;  %v909_v2 = vmov 0   ;;  %v402_v3 = vlaneseq  ;;  %s710_s9 = sshll.u32 %s890_s30, 3  ;;  %s1166_s18 = sld [smem:[#allocation9_spill]]  ;;  %vm422_vm2 = vcmask 261120   ;;  %vm458_vm8 = vcmask 7168  }
  0x32   : > { %792 = vset.pattern.permute.xlu0 %v909_v2  ;;  %v405_v5 = vstv %s710_s9  ;;  %v397_v7 = vld [vmem:[%s374_s21] sm:$0xff]  ;;  %s1167_s23 = sld [smem:[#allocation7_spill]]  ;;  %s1168_s24 = scalar_lea.vmem [#allocation2], %s1035_s20  ;;  %vm471_vm9 = vcmask 0  }
  0x33   : > { %415 = vperm.xlu0 %792, %v398_v1   ;;  %v403_v4 = vshrl.u32 %v402_v3, 7  ;;  %v413_v12 = vand.u32 127, %v402_v3  ;;  %v396_v14 = vld [vmem:[%s1168_s24] sm:$0xff]  ;;  %s1169_s26 = sld [smem:[#allocation8_spill]] }
  0x35   : > { %v1072_v6 = vadd.s32 %v405_v5, %v403_v4 }
  0x37   : > { %vm407_vm1 = vcmp.lt.s32.totalorder %v1072_v6, 12  ;;  %v794_v8 = vld [vmem:[%s1166_s18] ss:$0 sm:$0xff] }
  0x38   : > { %v411_v9 = vsel %vm407_vm1, %v397_v7, 0.0  ;;  %v793_v13 = vld [vmem:[%s1167_s23] ss:$0 sm:$0xff]  ;;  %v410_v17 = vsel %vm407_vm1, %v396_v14, 0.0 }
  0x39   : > { %v491_v10 = vmul.f32 %v794_v8, %v411_v9  ;;  %v1090_v19 = vmul.f32 %v794_v8, %v410_v17  ;;  %v795_v44 = vld [vmem:[%s1169_s26] ss:$0 sm:$0xff] }
  0x3b   : > { %v505_v11 = vsel %vm422_vm2, %v491_v10, -inf  ;;  %v492_v20 = vsel %vm422_vm2, %v1090_v19, -inf }
  0x5d   : > { %506 = vmax.xlane.f32.xlu0 %v505_v11 }
  0xa5   : > { %v416_v15 = vpop.permute.xlu0 %415 }
  0xa6   : > { %vm417_vm3 = vcmp.eq.s32.totalorder %v413_v12, %v416_v15 }
  0xa7   : > { %v421_v16 = vsel %vm417_vm3, %v793_v13, 0.0  ;;  %v449_v48 = vsel %vm417_vm3, %v795_v44, 0.0 }
  0xa8   : > { %v423_v18 = vsel %vm422_vm2, %v421_v16, 0.0  ;;  %v450_v52 = vsel %vm422_vm2, %v449_v48, 0.0  ;;  %v538_v48 = vld [vmem:[%s1065_s4] sm:$0x1] }
  0xa9   : > { %424 = vadd.xlane.f32.xlu1 %v423_v18 }
  0xb1   : > { %493 = vmax.xlane.f32.xlu1 %v492_v20 }
  0xd0   : > { %v507_v21 = vpop.xlane.xlu0 %506 }
  0xd1   : > { %v508_v22 = vsub.f32 %v491_v10, %v507_v21 }
  0xd3   : > { %v509_v23 = vmul.f32 1.442695, %v508_v22 }
  0xd5   : > { %796 = vpow2.f32 %v509_v23 }
  0xdb   : > { %v797_v30 = vpop.eup %796 }
  0xdc   : > { %v511_v33 = vsel %vm422_vm2, %v797_v30, 0.0 }
 0x11c   : > { %v425_v24 = vpop.xlane.xlu1 %424 }
 0x11d   : > { %v426_v25 = vmul.f32 30.0, %v425_v24 }
 0x11f   : > { %v427_v26 = vsub.f32 %v410_v17, %v426_v25 }
 0x121   : > { %v428_v27 = vsel %vm417_vm3, %v427_v26, %v410_v17  ;;  %v441_v36 = vsel %vm417_vm3, %v427_v26, 0.0 }
 0x122   : > { %v429_v28 = vsel %vm422_vm2, %v428_v27, -inf  ;;  %v442_v37 = vsel %vm422_vm2, %v441_v36, 0.0 }
 0x123   : > { %430 = vmax.xlane.f32.xlu2 %v429_v28 }
 0x124   : > { %v494_v29 = vpop.xlane.xlu1 %493 }
 0x125   : > { %v495_v31 = vsub.f32 %v1090_v19, %v494_v29 }
 0x127   : > { %v496_v32 = vmul.f32 1.442695, %v495_v31 }
 0x129   : > { %798 = vpow2.f32 %v496_v32 }
 0x12b   : > { %512 = vadd.xlane.f32.xlu2 %v511_v33 }
 0x12f   : > { %v799_v34 = vpop.eup %798 }
 0x130   : > { %v498_v35 = vsel %vm422_vm2, %v799_v34, 0.0 }
 0x131   : > { %499 = vadd.xlane.f32.xlu1 %v498_v35 }
 0x139   : > { %443 = vadd.xlane.f32.xlu1 %v442_v37 }
 0x196   : > { %v431_v38 = vpop.xlane.xlu2 %430 }
 0x197   : > { %v432_v39 = vsub.f32 %v428_v27, %v431_v38 }
 0x199   : > { %v433_v40 = vmul.f32 1.442695, %v432_v39 }
 0x19b   : > { %800 = vpow2.f32 %v433_v40 }
 0x19e   : > { %v513_v41 = vpop.xlane.xlu2 %512 }
 0x19f   : > { %802 = vrcp.f32 %v513_v41  ;;  %v525_v51 = vand.u32 2147483648, %v513_v41  ;;  %v523_v54 = vand.u32 2147483647, %v513_v41  ;;  %vm519_vm5 = vweird.f32 %v513_v41 }
 0x1a0   : > { %804 = vlog2.f32 %v513_v41 }
 0x1a1   : > { %v801_v42 = vpop.eup %800  ;;  %v526_v59 = vor.u32 1.1754944e-38, %v525_v51  ;;  %vm524_vm7 = vcmp.eq.f32.partialorder %v523_v54, 8.507059e+37 }
 0x1a2   : > { %v435_v43 = vsel %vm422_vm2, %v801_v42, 0.0  ;;  %v455_v42 = vld [vmem:[%s1055_s27] sm:$0x1] }
 0x1a3   : > { %436 = vadd.xlane.f32.xlu2 %v435_v43  ;;  %v473_v43 = vld [vmem:[%s1060_s16] sm:$0x1] }
 0x1a4   : > { %v500_v45 = vpop.xlane.xlu1 %499 }
 0x1a5   : > { %v803_v46 = vpop.eup %802  ;;  %806 = vlog2.f32 %v500_v45 }
 0x1a6   : > { %v515_v47 = vmul.f32 %v803_v46, %v513_v41  ;;  %v805_v50 = vpop.eup %804  ;;  %vm520_vm4 = vweird.f32 %v803_v46 }
 0x1a7   : > { %v530_v58 = vmul.f32 0.6931472, %v805_v50  ;;  %vm521_vm6 = vmor %vm519_vm5, %vm520_vm4 }
 0x1a8   : > { %v516_v49 = vsub.f32 1.0, %v515_v47 }
 0x1a9   : > { %v531_v0 = vsub.f32 %v508_v22, %v530_v58 }
 0x1aa   : > { %v517_v53 = vmul.f32 %v803_v46, %v516_v49 }
 0x1ab   : > { %v807_v55 = vpop.eup %806  ;;  %451 = vadd.xlane.f32.xlu2 %v450_v52 }
 0x1ac   : > { %v502_v56 = vmul.f32 0.6931472, %v807_v55  ;;  %v518_v57 = vadd.f32 %v803_v46, %v517_v53  ;;  %v444_v13 = vpop.xlane.xlu1 %443 }
 0x1ae   : > { %v503_v60 = vadd.f32 %v502_v56, %v494_v29  ;;  %v522_v61 = vsel %vm521_vm6, %v803_v46, %v518_v57 }
 0x1af   : > { %v527_v62 = vsel %vm524_vm7, %v526_v59, %v522_v61 }
 0x1b0   : > { %v504_v63 = vsub.f32 %v1090_v19, %v503_v60  ;;  %v528_v1 = vmul.f32 %v797_v30, %v527_v62 }
 0x1b2   : > { %v532_v2 = vsub.f32 %v531_v0, %v504_v63 }
 0x1b4   : > { %v533_v3 = vmul.f32 %v532_v2, %v528_v1 }
 0x1b6   : > { %v534_v4 = vsel %vm422_vm2, %v533_v3, 0.0 }
 0x1b7   : > { %535 = vadd.xlane.f32.xlu1 %v534_v4 }
 0x216   : > { %v437_v5 = vpop.xlane.xlu2 %436 }
 0x217   : > { %808 = vlog2.f32 %v437_v5 }
 0x21d   : > { %v809_v7 = vpop.eup %808 }
 0x21e   : > { %v439_v8 = vmul.f32 0.6931472, %v809_v7  ;;  %v452_v9 = vpop.xlane.xlu2 %451 }
 0x21f   : > { %v453_v10 = vsel %vm407_vm1, %v452_v9, 0.0 }
 0x220   : > { %v440_v11 = vadd.f32 %v439_v8, %v431_v38  ;;  %v474_v12 = vsel %vm458_vm8, %v453_v10, 0.0  ;;  %v456_v15 = vsub.f32 0.0, %v453_v10 }
 0x221   : > { %475 = vadd.xlane.f32.xlu1 %v474_v12 }
 0x222   : > { %v445_v14 = vsub.f32 %v444_v13, %v440_v11 }
 0x224   : > { %v454_v16 = vsel %vm407_vm1, %v445_v14, 0.0 }
 0x225   : > { %v457_v17 = vmul.f32 %v456_v15, %v454_v16 }
 0x227   : > { %v459_v18 = vsel %vm458_vm8, %v457_v17, 0.0 }
 0x228   : > { %460 = vadd.xlane.f32.xlu2 %v459_v18 }
 0x22a   : > { %v536_v19 = vpop.xlane.xlu1 %535 }
 0x22b   : > { %v537_v20 = vsel %vm407_vm1, %v536_v19, 0.0 }
 0x22c   : > { %v539_v21 = vsel %vm458_vm8, %v537_v20, 0.0 }
 0x230   : > { %540 = vadd.xlane.f32.xlu2 %v539_v21 }
 0x294   : > { %v476_v22 = vpop.xlane.xlu1 %475 }
 0x295   : > { %v477_v23 = vrot.slane %v476_v22, 4 }
 0x297   : > { %v478_v24 = vadd.f32 %v477_v23, %v476_v22 }
 0x299   : > { %v479_v25 = vrot.slane %v478_v24, 2 }
 0x29b   : > { %v461_v26 = vpop.xlane.xlu2 %460  ;;  %v480_v29 = vadd.f32 %v479_v25, %v478_v24 }
 0x29c   : > { %v462_v27 = vrot.slane %v461_v26, 4 }
 0x29d   : > { %v481_v33 = vrot.slane %v480_v29, 1 }
 0x29e   : > { %v463_v28 = vadd.f32 %v462_v27, %v461_v26 }
 0x29f   : > { %v482_v37 = vadd.f32 %v481_v33, %v480_v29 }
 0x2a0   : > { %v464_v30 = vrot.slane %v463_v28, 2 }
 0x2a2   : > { %v465_v31 = vadd.f32 %v464_v30, %v463_v28 }
 0x2a3   : > { %v541_v32 = vpop.xlane.xlu2 %540 }
 0x2a4   : > { %v542_v34 = vrot.slane %v541_v32, 4  ;;  %v466_v6 = vrot.slane %v465_v31, 1 }
 0x2a6   : > { %v543_v35 = vadd.f32 %v542_v34, %v541_v32  ;;  %v467_v36 = vadd.f32 %v466_v6, %v465_v31 }
 0x2a8   : > { %v544_v38 = vrot.slane %v543_v35, 2  ;;  %713 = vpush %v467_v36 }
 0x2a9   : > { %715 = vpush %v482_v37 }
 0x2aa   : > { %v545_v39 = vadd.f32 %v544_v38, %v543_v35 }
 0x2ac   : > { %v546_v40 = vrot.slane %v545_v39, 1 }
 0x2ae   : > { %v547_v41 = vadd.f32 %v546_v40, %v545_v39 }
 0x2b0   : > { %717 = vpush %v547_v41 }
 0x2d9   : > { %s714_s19 = spop %713 }
 0x2da   : > { %v469_v44 = vstv %s714_s19  ;;  %s716_s13 = spop %715 }
 0x2db   : > { %v470_v45 = vadd.f32 %v469_v44, %v455_v42  ;;  %v484_v46 = vstv %s716_s13 }
 0x2dc   : > { %v485_v47 = vadd.f32 %v484_v46, %v473_v43 }
 0x2dd   : > { %472 = vst.msk [vmem:[%s1055_s27] sm:$0x1] %vm471_vm9, %v470_v45 }
 0x2de   : > { %486 = vst.msk [vmem:[%s1060_s16] sm:$0x1] %vm471_vm9, %v485_v47 }
 0x2e1   : > { %s718_s17 = spop %717 }
 0x2e2   : > { %v549_v49 = vstv %s718_s17 }
 0x2e3   : > { %v550_v50 = vadd.f32 %v549_v49, %v538_v48 }
 0x2e5   : > { %551 = vst.msk [vmem:[%s1065_s4] sm:$0x1] %vm471_vm9, %v550_v50 }
 0x2e6 PF: > { %s22_s12 = sadd.s32 1, %s906_s12   ;;  %s1170_s3 = sld [smem:[#allocation5_spill]] }
 0x2e7   : > { %p19_p3 = scmp.ge.s32.totalorder %s22_s12, 8   ;;  %s1171_s5 = sld [smem:[#allocation6_spill]] }
 0x2e8   : > { %s1172_s27 = smov %s882_s28  ;;  %s1173_s28 = smov %s886_s29 }
 0x2e9   : > { %s1174_s29 = smov %s1022_s25  ;;  %s1175_s30 = smov %s898_s10 }
 0x2ea   : > { %s1176_s9 = smov %s902_s11  ;;  %21 = sbr.rel (!%p19_p3) target bundleno = 9 (0x9), region = 118 }
 0x2ec   : > { %s1177_s10 = smov %s1170_s3 }
 0x2ed   : > { %s1178_s11 = smov %s1171_s5 }
 0x2ef   :  { %593 = vsyncpa [#allocation3], 1 }
 0x2f0   :  { %595 = vsyncpa [#allocation3 + $0x1], 1 }

</bundles_post_ra>
